<compile_context>
chip_gen: v6e
topology: v6e:2x2x1
jax: 0.10.0
libtpu: 0.0.40
codegen_flags: <defaults>
</compile_context>

<pallas_src>
import jax
import jax.numpy as jnp
from jax.experimental import pallas as pl
from jax.experimental.pallas import tpu as pltpu

EPS = 1e-5  # nn.LayerNorm default


# ----------------------------------------------------------------------------
# Kernel
# ----------------------------------------------------------------------------
def _prenorm_kernel(x_ref, gamma_ref, beta_ref, w_ref, b_ref, o_ref, normed_ref):
    """Grid: (row_blocks, n_blocks).

    CORRECTNESS NOTE: the `pl.when(n == 0)` + persistent `normed_ref` scratch
    is only valid because grid axis 1 (Linear output N) is the innermost
    *sequential* ("arbitrary") axis and x's block index is constant across n.
    Do not reorder the grid or mark axis 1 "parallel".

    x_ref:      (row_tile, D)   activations tile
    gamma_ref:  (1, D), beta_ref: (1, D)   LayerNorm affine
    w_ref:      (D, tn), b_ref: (1, tn)    fn = Linear(D, D), possibly N-tiled
    o_ref:      (row_tile, tn)
    normed_ref: (row_tile, D) VMEM scratch holding LN(x) in the GEMM dtype
    """
    n = pl.program_id(1)

    # LayerNorm once per row tile (reused across all N blocks).  LN and the
    # GEMM are strictly per-row, so garbage rows from a padded partial row
    # block never contaminate valid rows and are masked on store by Pallas.
    @pl.when(n == 0)
    def _():
        x = x_ref[...].astype(jnp.float32)
        mean = jnp.mean(x, axis=-1, keepdims=True)
        xc = x - mean
        var = jnp.mean(xc * xc, axis=-1, keepdims=True)   # biased, like PyTorch
        inv = jax.lax.rsqrt(var + EPS)
        g = gamma_ref[...].astype(jnp.float32)
        bt = beta_ref[...].astype(jnp.float32)
        normed_ref[...] = (xc * inv * g + bt).astype(normed_ref.dtype)

    # fn(normed): Linear on the MXU, f32 accumulation.
    y = jnp.dot(normed_ref[...], w_ref[...], preferred_element_type=jnp.float32)
    y = y + b_ref[...].astype(jnp.float32)
    o_ref[...] = y.astype(o_ref.dtype)


# ----------------------------------------------------------------------------
# Tiling helpers
# ----------------------------------------------------------------------------
def _round_down(x, m):
    return (x // m) * m


def _round_up(x, m):
    return ((x + m - 1) // m) * m


def _vmem_capacity_bytes():
    try:
        return int(pltpu.get_tpu_info().vmem_capacity_bytes)
    except Exception:  # conservative fallback (smaller tiles always compile)
        return 64 << 20


def _select_tiling(rows, D, x_itemsize, mm_itemsize, out_itemsize):
    """Chip/VMEM/D-aware tile selection.

    Returns (row_tile, row_blocks, tn, n_blocks, x_buffers, vmem_limit_bytes).
    """
    vmem_cap = _vmem_capacity_bytes()
    small_vmem = vmem_cap <= (64 << 20)        # v7x-like: 64 MiB/TC, 2 TCs/chip
    if small_vmem:
        budget = 48 << 20                      # leave compiler-scratch headroom
    else:
        budget = min(int(vmem_cap * 0.8), 100 << 20)   # v5e/v6e: 128 MiB

    small = 8 * D * 4                          # gamma/beta/bias + slack

    # --- W residency vs. N tiling -------------------------------------------
    w_full = D * D * mm_itemsize
    if w_full <= budget // 2 or D % 128 != 0:
        # Keep W resident in VMEM (single-buffered): fetched from HBM once,
        # never re-streamed per row block.  Also the only option when D is not
        # a multiple of 128 (can't N-tile lane-dense).
        tn, n_blocks, w_bytes, x_bufs = D, 1, w_full, 2
    else:
        # W too big to keep resident: N-tile it (tn multiple of 128), stream.
        tn = _round_down(max((budget // 3) // (2 * D * mm_itemsize), 128), 128)
        tn = min(tn, D)
        while tn > 128 and D % tn != 0:
            tn -= 128
        tn = max(tn, 128)
        n_blocks = D // tn
        w_bytes = 2 * D * tn * mm_itemsize     # double-buffered W slab
        # x only changes at row-block boundaries: 3-deep pipeline lets its
        # (large) DMA start earlier and hide under several n-step matmuls.
        x_bufs = 3

    # --- row tile ------------------------------------------------------------
    align = 16 if x_itemsize == 2 else 8
    per_row = (x_bufs * D * x_itemsize         # x (multi-buffered)
               + 2 * tn * out_itemsize         # out (double-buffered)
               + D * mm_itemsize)              # normed LN cache (scratch)
    avail = budget - w_bytes - small
    row_tile = _round_down(max(avail // per_row, align), align)
    row_tile = min(row_tile, 1024)             # past ~512 rows overhead is ~0

    if small_vmem and rows > 2 * align:
        # v7x: two TensorCores shard the "parallel" row axis -> make sure
        # there are at least 2 row blocks so neither core idles.
        row_tile = min(row_tile, _round_up(pl.cdiv(rows, 2), align))
    if row_tile >= rows:
        row_tile = rows                        # single full block
    row_blocks = pl.cdiv(rows, row_tile)       # partial last block is masked

    return row_tile, row_blocks, tn, n_blocks, x_bufs, budget


# ----------------------------------------------------------------------------
# Wrapper
# ----------------------------------------------------------------------------
def prenorm(x, gamma, beta, w, b, *, mxu_bf16=None):
    """x: (B, S, D). Returns fn(LayerNorm(x)) with fn = Linear(D, D).

    mxu_bf16: None  -> bf16 GEMM iff x is bf16 (exact f32 GEMM otherwise);
              True  -> force bf16 GEMM inputs (f32 accumulation) on the MXU —
                       a large MXU-throughput win on v6e/v7x for big D.
    """
    B, S, D = x.shape
    rows = B * S
    x2 = x.reshape(rows, D)

    if mxu_bf16 is None:
        mxu_bf16 = x.dtype == jnp.bfloat16
    mm_dtype = jnp.bfloat16 if mxu_bf16 else jnp.float32
    # Cast W to the GEMM dtype only if needed.  Callers should store weights
    # in mm_dtype so this is a no-op (the cast is a separate XLA op costing
    # ~6*D^2 HBM bytes per invocation).
    w_mm = w if w.dtype == mm_dtype else w.astype(mm_dtype)

    x_itemsize = jnp.dtype(x.dtype).itemsize
    mm_itemsize = jnp.dtype(mm_dtype).itemsize
    row_tile, row_blocks, tn, n_blocks, x_bufs, vmem_limit = _select_tiling(
        rows, D, x_itemsize, mm_itemsize, x_itemsize)

    gamma2 = gamma.reshape(1, D)
    beta2 = beta.reshape(1, D)
    b2 = b.reshape(1, D)

    # Grid-invariant operands: single-buffer (fetched once, halves footprint).
    single = pl.Buffered(1)
    gamma_spec = pl.BlockSpec((1, D), lambda i, n: (0, 0), pipeline_mode=single)
    beta_spec = pl.BlockSpec((1, D), lambda i, n: (0, 0), pipeline_mode=single)
    if n_blocks == 1:
        x_spec = pl.BlockSpec((row_tile, D), lambda i, n: (i, 0))
        w_spec = pl.BlockSpec((D, tn), lambda i, n: (0, 0), pipeline_mode=single)
        b_spec = pl.BlockSpec((1, tn), lambda i, n: (0, 0), pipeline_mode=single)
    else:
        x_spec = pl.BlockSpec((row_tile, D), lambda i, n: (i, 0),
                              pipeline_mode=pl.Buffered(x_bufs))
        w_spec = pl.BlockSpec((D, tn), lambda i, n: (0, n))
        b_spec = pl.BlockSpec((1, tn), lambda i, n: (0, n))

    # W traffic: once when resident; re-streamed per row block when N-tiled.
    w_traffic = D * D * mm_itemsize * (row_blocks if n_blocks > 1 else 1)
    cost = pl.CostEstimate(
        flops=2 * rows * D * D + 6 * rows * D,
        transcendentals=rows,                         # rsqrt per row
        bytes_accessed=(rows * D * x_itemsize         # x
                        + w_traffic                   # W
                        + rows * D * x_itemsize       # out
                        + 3 * D * 4),                 # gamma/beta/bias
    )

    out2 = pl.pallas_call(
        _prenorm_kernel,
        out_shape=jax.ShapeDtypeStruct((rows, D), x.dtype),
        grid_spec=pltpu.PrefetchScalarGridSpec(
            num_scalar_prefetch=0,
            grid=(row_blocks, n_blocks),
            in_specs=[x_spec, gamma_spec, beta_spec, w_spec, b_spec],
            out_specs=pl.BlockSpec((row_tile, tn), lambda i, n: (i, n)),
            scratch_shapes=[pltpu.VMEM((row_tile, D), mm_dtype)],  # normed cache
        ),
        compiler_params=pltpu.CompilerParams(
            dimension_semantics=("parallel", "arbitrary"),
            vmem_limit_bytes=int(vmem_limit),
        ),
        cost_estimate=cost,
    )(x2, gamma2, beta2, w_mm, b2)

    return out2.reshape(B, S, D)


def prenorm_ref(x, gamma, beta, w, b):
    """Pure-JAX reference matching PyTorch nn.LayerNorm + Linear semantics."""
    xf = x.astype(jnp.float32)
    mean = jnp.mean(xf, axis=-1, keepdims=True)
    var = jnp.mean((xf - mean) ** 2, axis=-1, keepdims=True)
    normed = (xf - mean) * jax.lax.rsqrt(var + EPS) * gamma + beta
    return (normed @ w + b).astype(x.dtype)


if __name__ == "__main__":
    key = jax.random.PRNGKey(0)
    B, S, D = 2, 8, 32
    # NOTE: D=32 is lane-sparse (masked stores); real workloads use D a
    # multiple of 128 so the resident-W / lane-dense N-tiled paths are
    # exercised.  Kernel handles both.

    kx, kg, kb, kw, kbias = jax.random.split(key, 5)
    x = jax.random.normal(kx, (B, S, D), dtype=jnp.float32)

    # nn.LayerNorm(dim) init is gamma=1, beta=0; perturb deterministically so
    # the affine path is exercised.
    gamma = 1.0 + 0.1 * jax.random.normal(kg, (D,), dtype=jnp.float32)
    beta = 0.1 * jax.random.normal(kb, (D,), dtype=jnp.float32)

    # fn = Linear(D, D): deterministic synthetic weights.
    # TODO(synk): `fn` in PreNorm is an arbitrary wrapped module; only the
    # canonical Linear(dim, dim) instantiation is fused here.
    w = jax.random.normal(kw, (D, D), dtype=jnp.float32) / jnp.sqrt(D)
    bias = 0.1 * jax.random.normal(kbias, (D,), dtype=jnp.float32)

    # ---- f32 path (exact) ----
    out = jax.block_until_ready(prenorm(x, gamma, beta, w, bias))
    ref = prenorm_ref(x, gamma, beta, w, bias)
    assert out.shape == (B, S, D)
    assert jnp.allclose(out, ref, atol=1e-5, rtol=1e-5), (
        float(jnp.max(jnp.abs(out - ref))))

    # ---- bf16 path (LN in f32, GEMM inputs bf16): looser tolerance ----
    xb = x.astype(jnp.bfloat16)
    wb = w.astype(jnp.bfloat16)
    out_b = jax.block_until_ready(prenorm(xb, gamma, beta, wb, bias))
    ref_b = prenorm_ref(xb, gamma, beta, wb.astype(jnp.float32), bias)
    err_b = jnp.max(jnp.abs(out_b.astype(jnp.float32) - ref_b.astype(jnp.float32)))
    assert jnp.allclose(out_b.astype(jnp.float32), ref_b.astype(jnp.float32),
                        atol=1e-1, rtol=1e-1), float(err_b)

    print("KERNEL_OK")
</pallas_src>

<mosaic_0001>
module attributes {stable_mosaic.version = 11 : i64} {
  func.func @_prenorm_kernel(%arg0: i32, %arg1: i32, %arg2: memref<16x32xf32, #tpu.memory_space<vmem>>, %arg3: memref<1x32xf32, #tpu.memory_space<vmem>>, %arg4: memref<1x32xf32, #tpu.memory_space<vmem>>, %arg5: memref<32x32xf32, #tpu.memory_space<vmem>>, %arg6: memref<1x32xf32, #tpu.memory_space<vmem>>, %arg7: memref<16x32xf32, #tpu.memory_space<vmem>>, %arg8: memref<16x32xf32, #tpu.memory_space<vmem>>) attributes {dimension_semantics = [#tpu.dimension_semantics<parallel>, #tpu.dimension_semantics<arbitrary>], iteration_bounds = array<i64: 1, 1>, scalar_prefetch = 0 : i64, scratch_operands = 1 : i64, tpu.core_type = #tpu.core_type<tc>, window_params = [{transform_indices = @transform_0, window_bounds = array<i64: 16, 32>}, {pipeline_mode = #tpu.pipeline_mode<synchronous>, transform_indices = @transform_1, window_bounds = array<i64: 1, 32>}, {pipeline_mode = #tpu.pipeline_mode<synchronous>, transform_indices = @transform_2, window_bounds = array<i64: 1, 32>}, {pipeline_mode = #tpu.pipeline_mode<synchronous>, transform_indices = @transform_3, window_bounds = array<i64: 32, 32>}, {pipeline_mode = #tpu.pipeline_mode<synchronous>, transform_indices = @transform_4, window_bounds = array<i64: 1, 32>}, {transform_indices = @transform_5, window_bounds = array<i64: 16, 32>}]} {
    %c0_i32 = arith.constant 0 : i32
    %0 = arith.cmpi eq, %arg1, %c0_i32 : i32
    %1 = arith.extui %0 : i1 to i32
    %c0_i32_0 = arith.constant 0 : i32
    %2 = arith.cmpi ne, %1, %c0_i32_0 : i32
    scf.if %2 {
      %c0_8 = arith.constant 0 : index
      %c0_9 = arith.constant 0 : index
      %10 = vector.load %arg2[%c0_8, %c0_9] : memref<16x32xf32, #tpu.memory_space<vmem>>, vector<16x32xf32>
      %cst_10 = arith.constant dense<0.000000e+00> : vector<16xf32>
      %11 = vector.multi_reduction <add>, %10, %cst_10 [1] : vector<16x32xf32> to vector<16xf32>
      %12 = vector.shape_cast %11 : vector<16xf32> to vector<16x1xf32>
      %cst_11 = arith.constant 3.200000e+01 : f32
      %13 = vector.broadcast %cst_11 : f32 to vector<16x1xf32>
      %14 = arith.divf %12, %13 : vector<16x1xf32>
      %15 = vector.broadcast %14 : vector<16x1xf32> to vector<16x32xf32>
      %16 = arith.subf %10, %15 : vector<16x32xf32>
      %17 = arith.mulf %16, %16 : vector<16x32xf32>
      %cst_12 = arith.constant dense<0.000000e+00> : vector<16xf32>
      %18 = vector.multi_reduction <add>, %17, %cst_12 [1] : vector<16x32xf32> to vector<16xf32>
      %19 = vector.shape_cast %18 : vector<16xf32> to vector<16x1xf32>
      %cst_13 = arith.constant 3.200000e+01 : f32
      %20 = vector.broadcast %cst_13 : f32 to vector<16x1xf32>
      %21 = arith.divf %19, %20 : vector<16x1xf32>
      %cst_14 = arith.constant 9.99999974E-6 : f32
      %22 = vector.broadcast %cst_14 : f32 to vector<16x1xf32>
      %23 = arith.addf %21, %22 : vector<16x1xf32>
      %24 = math.rsqrt %23 : vector<16x1xf32>
      %c0_15 = arith.constant 0 : index
      %c0_16 = arith.constant 0 : index
      %25 = vector.load %arg3[%c0_15, %c0_16] : memref<1x32xf32, #tpu.memory_space<vmem>>, vector<1x32xf32>
      %c0_17 = arith.constant 0 : index
      %c0_18 = arith.constant 0 : index
      %26 = vector.load %arg4[%c0_17, %c0_18] : memref<1x32xf32, #tpu.memory_space<vmem>>, vector<1x32xf32>
      %27 = vector.broadcast %24 : vector<16x1xf32> to vector<16x32xf32>
      %28 = arith.mulf %16, %27 : vector<16x32xf32>
      %29 = vector.broadcast %25 : vector<1x32xf32> to vector<16x32xf32>
      %30 = arith.mulf %28, %29 : vector<16x32xf32>
      %31 = vector.broadcast %26 : vector<1x32xf32> to vector<16x32xf32>
      %32 = arith.addf %30, %31 : vector<16x32xf32>
      %c0_19 = arith.constant 0 : index
      %c0_20 = arith.constant 0 : index
      %33 = vector.load %arg8[%c0_19, %c0_20] : memref<16x32xf32, #tpu.memory_space<vmem>>, vector<16x32xf32>
      tpu.vector_store %arg8[%c0_19, %c0_20], %32 {strides = array<i32>} : memref<16x32xf32, #tpu.memory_space<vmem>>, vector<16x32xf32>,
    } else {
    }
    %c0 = arith.constant 0 : index
    %c0_1 = arith.constant 0 : index
    %3 = vector.load %arg8[%c0, %c0_1] : memref<16x32xf32, #tpu.memory_space<vmem>>, vector<16x32xf32>
    %c0_2 = arith.constant 0 : index
    %c0_3 = arith.constant 0 : index
    %4 = vector.load %arg5[%c0_2, %c0_3] : memref<32x32xf32, #tpu.memory_space<vmem>>, vector<32x32xf32>
    %cst = arith.constant dense<0.000000e+00> : vector<16x32xf32>
    %5 = tpu.matmul %3, %4, %cst {dimension_numbers = #tpu.dot_dimension_numbers<[1], [0], [0], [1], [0, 0, 1, 1], [], []>} : vector<16x32xf32>, vector<32x32xf32>, vector<16x32xf32> -> vector<16x32xf32>
    %c0_4 = arith.constant 0 : index
    %c0_5 = arith.constant 0 : index
    %6 = vector.load %arg6[%c0_4, %c0_5] : memref<1x32xf32, #tpu.memory_space<vmem>>, vector<1x32xf32>
    %7 = vector.broadcast %6 : vector<1x32xf32> to vector<16x32xf32>
    %8 = arith.addf %5, %7 : vector<16x32xf32>
    %c0_6 = arith.constant 0 : index
    %c0_7 = arith.constant 0 : index
    %9 = vector.load %arg7[%c0_6, %c0_7] : memref<16x32xf32, #tpu.memory_space<vmem>>, vector<16x32xf32>
    tpu.vector_store %arg7[%c0_6, %c0_7], %8 {strides = array<i32>} : memref<16x32xf32, #tpu.memory_space<vmem>>, vector<16x32xf32>,
    return
  }
  func.func @transform_0(%arg0: i32, %arg1: i32) -> (i32, i32) {
    %c0_i32 = arith.constant 0 : i32
    %c0_i32_0 = arith.constant 0 : i32
    return %arg0, %c0_i32 : i32, i32
  }
  func.func @transform_1(%arg0: i32, %arg1: i32) -> (i32, i32) {
    %c0_i32 = arith.constant 0 : i32
    %c0_i32_0 = arith.constant 0 : i32
    %c0_i32_1 = arith.constant 0 : i32
    return %c0_i32, %c0_i32_0 : i32, i32
  }
  func.func @transform_2(%arg0: i32, %arg1: i32) -> (i32, i32) {
    %c0_i32 = arith.constant 0 : i32
    %c0_i32_0 = arith.constant 0 : i32
    %c0_i32_1 = arith.constant 0 : i32
    return %c0_i32, %c0_i32_0 : i32, i32
  }
  func.func @transform_3(%arg0: i32, %arg1: i32) -> (i32, i32) {
    %c0_i32 = arith.constant 0 : i32
    %c0_i32_0 = arith.constant 0 : i32
    %c0_i32_1 = arith.constant 0 : i32
    return %c0_i32, %c0_i32_0 : i32, i32
  }
  func.func @transform_4(%arg0: i32, %arg1: i32) -> (i32, i32) {
    %c0_i32 = arith.constant 0 : i32
    %c0_i32_0 = arith.constant 0 : i32
    %c0_i32_1 = arith.constant 0 : i32
    return %c0_i32, %c0_i32_0 : i32, i32
  }
  func.func @transform_5(%arg0: i32, %arg1: i32) -> (i32, i32) {
    %c0_i32 = arith.constant 0 : i32
    return %arg0, %arg1 : i32, i32
  }
}

</mosaic_0001>

<bundles_post_ra>
// kernel: tpu_custom_call.1
= control target key start
LH: loop header
LB: loop body
LE: loop exit
PB: predicated region body
PF: predicated region fallthrough
CT: control target
= control target key end

     0   :  { %10 = vsyncpa [#allocation4], 0  ;;  %s387_s0 = inlined_call_operand.hbm [shape: f32[16,32], index: 0, kind: input, shape index: {}]   ;;  %s388_s1 = inlined_call_operand.vmem [shape: f32[1,32], index: 1, kind: input, shape index: {}]   ;;  %s389_s2 = inlined_call_operand.vmem [shape: f32[1,32], index: 2, kind: input, shape index: {}]   ;;  %s390_s3 = inlined_call_operand.hbm [shape: f32[32,32], index: 3, kind: input, shape index: {}]   ;;  %s391_s4 = inlined_call_operand.vmem [shape: f32[1,32], index: 4, kind: input, shape index: {}]   ;;  %s392_s5 = inlined_call_operand.hbm [shape: f32[16,32], index: 5, kind: output, shape index: {}]  }
   0x1   :  { %11 = vsyncpa [#allocation7], 0 }
   0x2   :  { %12 = vsyncpa [#allocation5], 0  ;;  %s315_s18 = smov [#allocation3]  }
   0x3   :  { %s18_s19 = sshll.u32 %s315_s18, 4  ;;  %s19_s19 = int_to_ptr.vmem [resolvable:$true] %s18_s19 }
   0x4   :  { %s257_s20 = scalar_lea.vmem %s19_s19, 256  ;;  %p262_p1 = scmp.lt.s32.totalorder %s19_s19, %s19_s19 }
   0x5   :  { %p258_p0 = scmp.ne.s32.totalorder %s19_s19, %s257_s20  ;;  %p263_p2 = scmp.lt.s32.totalorder %s257_s20, %s257_s20 }
   0x7   :  { %p264_p3 = por %p263_p2, %p262_p1 }
   0x9   :  { %p265_p4 = pnand %p264_p3, %p258_p0 }
   0xb   :  { %268 = shalt.err (!%p265_p4)
}
   0xc   :  { %s316_s21 = smov 128   ;;  %s317_s22 = smov 8  }
   0xd   :  { %24 = dma.hbm_to_vmem [thread:$0]  %s387_s0, 256, %s19_s19, [#allocation4], %s316_s21, %s316_s21, %s317_s22  }
   0xe   :  { %s318_s25 = smov [#allocation6]  }
   0xf   :  { %s34_s26 = sshll.u32 %s318_s25, 4  ;;  %s35_s26 = int_to_ptr.vmem [resolvable:$true] %s34_s26 }
  0x10   :  { %s277_s27 = scalar_lea.vmem %s35_s26, 512  ;;  %p282_p6 = scmp.lt.s32.totalorder %s35_s26, %s35_s26 }
  0x11   :  { %p278_p5 = scmp.ne.s32.totalorder %s35_s26, %s277_s27  ;;  %p283_p7 = scmp.lt.s32.totalorder %s277_s27, %s277_s27 }
  0x13   :  { %p284_p8 = por %p283_p7, %p282_p6 }
  0x15   :  { %p285_p9 = pnand %p284_p8, %p278_p5 }
  0x17   :  { %288 = shalt.err (!%p285_p9)
}
  0x18   :  { %40 = dma.hbm_to_vmem [thread:$0]  %s390_s3, 512, %s35_s26, [#allocation7], %s316_s21, %s316_s21, %s317_s22  }
  0x19   :  { %309 = dma.done.wait [#allocation4], 256  }
  0x1a   :  { %310 = vsyncadd [#allocation4], 4294967040 }
  0x1b   :  { %311 = dma.done.wait [#allocation7], 512  }
  0x1c   :  { %312 = vsyncadd [#allocation7], 4294966784  ;;  %vm55_vm0 = vcmask 261120   ;;  %v53_v0 = vld [vmem:[#allocation3] sm:$0xff]  ;;  %v54_v1 = vld [vmem:[#allocation3 + $0x8] sm:$0xff] }
  0x1d   :  { %v56_v2 = vsel %vm55_vm0, %v53_v0, 0.0  ;;  %v59_v3 = vsel %vm55_vm0, %v54_v1, 0.0  ;;  %v108_v14 = vld [vmem:[#allocation6 + $0x18] sm:$0xff]  ;;  %v107_v15 = vld [vmem:[#allocation6 + $0x10] sm:$0xff]  ;;  %v106_v16 = vld [vmem:[#allocation6 + $0x8] sm:$0xff] }
  0x1e   :  { %57 = vadd.xlane.f32.xlu0 %v56_v2  ;;  %229 = vmatprep.subr.mxu0 %v108_v14  ;;  %v105_v17 = vld [vmem:[#allocation6] sm:$0xff] }
  0x1f   :  { %230 = vmatpush3.msra.mxu0 %v108_v14  ;;  %v218_v25 = vld [vmem:[%s388_s1] ss:$0 sm:$0xff] }
  0x20   :  { %231 = vmatprep.subr.mxu0 %v107_v15  ;;  %v219_v27 = vld [vmem:[%s389_s2] ss:$0 sm:$0xff]  ;;  %s319_s2 = smov [#allocation8]  }
  0x21   :  { %232 = vmatpush3.msra.mxu0 %v107_v15  ;;  %v220_v36 = vld [vmem:[%s391_s4] ss:$0 sm:$0xff]  ;;  %s205_s8 = sshll.u32 %s319_s2, 4  ;;  %s206_s8 = int_to_ptr.vmem [resolvable:$true] %s205_s8 }
  0x22   :  { %60 = vadd.xlane.f32.xlu0 %v59_v3  ;;  %233 = vmatprep.subr.mxu0 %v106_v16  ;;  %s289_s9 = scalar_lea.vmem %s206_s8, 256  ;;  %p294_p11 = scmp.lt.s32.totalorder %s206_s8, %s206_s8 }
  0x23   :  { %234 = vmatpush3.msra.mxu0 %v106_v16  ;;  %p290_p10 = scmp.ne.s32.totalorder %s206_s8, %s289_s9  ;;  %p295_p12 = scmp.lt.s32.totalorder %s289_s9, %s289_s9 }
  0x24   :  { %235 = vmatprep.subr.mxu0 %v105_v17 }
  0x25   :  { %236 = vmatpush3.msra.mxu0 %v105_v17  ;;  %p296_p13 = por %p295_p12, %p294_p11 }
  0x27   :  { %p297_p0 = pnand %p296_p13, %p290_p10 }
  0xa7   :  { %v58_v4 = vpop.xlane.xlu0 %57 }
  0xa8   :  { %v63_v5 = vmul.f32 0.03125, %v58_v4 }
  0xaa   :  { %v65_v6 = vsub.f32 %v53_v0, %v63_v5 }
  0xab   :  { %v61_v7 = vpop.xlane.xlu0 %60 }
  0xac   :  { %v64_v8 = vmul.f32 0.03125, %v61_v7  ;;  %v67_v9 = vmul.f32 %v65_v6, %v65_v6 }
  0xae   :  { %v66_v10 = vsub.f32 %v54_v1, %v64_v8  ;;  %v69_v11 = vsel %vm55_vm0, %v67_v9, 0.0 }
  0xaf   :  { %70 = vadd.xlane.f32.xlu1 %v69_v11 }
  0xb0   :  { %v68_v12 = vmul.f32 %v66_v10, %v66_v10 }
  0xb2   :  { %v72_v13 = vsel %vm55_vm0, %v68_v12, 0.0 }
  0xb3   :  { %73 = vadd.xlane.f32.xlu1 %v72_v13 }
 0x138   :  { %v71_v18 = vpop.xlane.xlu1 %70 }
 0x139   :  { %v75_v19 = vmul.f32 0.03125, %v71_v18 }
 0x13b   :  { %v77_v20 = vadd.f32 1e-05, %v75_v19 }
 0x13c   :  { %v74_v21 = vpop.xlane.xlu1 %73 }
 0x13d   :  { %245 = vrsqrt.f32 %v77_v20  ;;  %v76_v22 = vmul.f32 0.03125, %v74_v21 }
 0x13f   :  { %v78_v23 = vadd.f32 1e-05, %v76_v22 }
 0x141   :  { %247 = vrsqrt.f32 %v78_v23 }
 0x14a   :  { %v246_v24 = vpop.eup %245 }
 0x14b   :  { %v83_v26 = vmul.f32 %v246_v24, %v65_v6 }
 0x14d   :  { %v91_v28 = vmul.f32 %v218_v25, %v83_v26 }
 0x14e   :  { %v248_v29 = vpop.eup %247 }
 0x14f   :  { %v99_v30 = vadd.f32 %v219_v27, %v91_v28  ;;  %v84_v31 = vmul.f32 %v248_v29, %v66_v10 }
 0x151   :  { %101 = vst.msk [vmem:[#allocation2] sm:$0xff] %vm55_vm0, %v99_v30  ;;  %v92_v32 = vmul.f32 %v218_v25, %v84_v31 }
 0x153   :  { %v100_v33 = vadd.f32 %v219_v27, %v92_v32 }
 0x155   :  { %102 = vst.msk [vmem:[#allocation2 + $0x8] sm:$0xff] %vm55_vm0, %v100_v33 }
 0x158   :  { %v103_v34 = vld [vmem:[#allocation2] sm:$0xff] }
 0x159   :  { %237 = vmatprep.mubr.msk.f32.mxu0 %vm55_vm0, %v103_v34 }
 0x15c   :  { %v104_v35 = vld [vmem:[#allocation2 + $0x8] sm:$0xff] }
 0x15d   :  { %238 = vmatmul.mubr.msk.f32.vlgmr.msra.gmra.mxu0 %vm55_vm0, %v104_v35 }
 0x21d   :  { %v239_v37 = vpop.f32.mrf.mxu0 }
 0x21e   :  { %v195_v38 = vadd.f32 %v239_v37, %v220_v36 }
 0x21f   :  { %v189_v39 = vpop.f32.mrf.mxu0 }
 0x220   :  { %199 = vst.msk [vmem:[#allocation8 + $0x8] sm:$0xff] %vm55_vm0, %v195_v38  ;;  %v190_v40 = vadd.f32 %v220_v36, %v189_v39 }
 0x222   :  { %198 = vst.msk [vmem:[#allocation8] sm:$0xff] %vm55_vm0, %v190_v40 }
 0x223   :  { %300 = shalt.err (!%p297_p0)
}
 0x224   :  { %211 = dma.vmem_to_hbm [thread:$0]  %s206_s8, 256, %s392_s5, [#allocation5], %s316_s21, %s316_s21, %s317_s22  }
 0x225   :  { %313 = dma.done.wait [#allocation5], 256  }
 0x226   :  { %314 = vsyncadd [#allocation5], 4294967040 }
 0x227   :  { %215 = vsyncpa [#allocation4], 1 }
 0x228   :  { %216 = vsyncpa [#allocation7], 1 }
 0x229   :  { %217 = vsyncpa [#allocation5], 1 }

</bundles_post_ra>
